<compile_context>
chip_gen: v6e
topology: v6e:2x2x1
jax: 0.10.0
libtpu: 0.0.40
codegen_flags: <defaults>
</compile_context>

<pallas_src>
import jax
import jax.numpy as jnp
from jax.experimental import pallas as pl
from jax.experimental.pallas import tpu as pltpu


def _round_up(n, m):
    return -(-n // m) * m


def _device_vmem_and_cores():
    """Physical VMEM bytes per TensorCore and whether the chip has >1 TC."""
    phys = None
    try:
        phys = pltpu.get_tpu_info().vmem_capacity_bytes
    except Exception:
        phys = None
    kind = ""
    try:
        kind = jax.devices()[0].device_kind.lower()
    except Exception:
        pass
    multi_tc = "v7" in kind            # v5e/v6e: 1 TC/chip; v7x: 2 TC/chip
    if phys is None:
        # Conservative fallback: assume the smallest (v7x-sized) VMEM unless
        # we positively know this is a 128 MiB-VMEM generation.
        phys = (128 << 20) if ("v5" in kind or "v6" in kind) else (64 << 20)
    return phys, multi_tc


def _block_bytes(k, c_in, c_out, hw, x_itemsize, s_itemsize):
    """Double-buffered VMEM footprint of one grid step's blocks (with padding)."""
    hw_p = _round_up(hw, 128)                              # lane padding
    b = (k * _round_up(c_in, 8) * hw_p * x_itemsize        # x block
         + k * _round_up(1, 8) * hw_p * s_itemsize         # S block
         + k * _round_up(c_out, 8) * hw_p * x_itemsize)    # out block
    return 2 * b                                            # double buffering


def _choose_tiling(N, C, C_out, HW, x_itemsize, s_itemsize, budget, multi_tc):
    """Pick (k, hw_tile): batch elements and lane extent per grid step."""
    one_elem = _block_bytes(1, C, C_out, HW, x_itemsize, s_itemsize)
    if one_elem <= budget:
        k_max = max(1, budget // one_elem)
        if multi_tc and N > 1:
            # Best-effort even step count so the "parallel" batch axis splits
            # evenly across the two TensorCores.
            steps = max(2, pl.cdiv(N, min(k_max, N)))
            if steps % 2:
                steps += 1
            k = pl.cdiv(N, steps)
        else:
            # Single TensorCore: biggest block that fits; no forced multi-step.
            k = min(N, k_max)
        return k, HW

    # A single batch element does not fit the budget: tile the lane (HW) axis.
    tile_unit = _block_bytes(1, C, C_out, 128, x_itemsize, s_itemsize)
    n_units = budget // tile_unit
    if n_units < 1:
        # TODO(synk): also tile the channel axis (needs a split index map for
        # the appended mask channel); not needed for realistic C at 128 lanes.
        raise NotImplementedError(
            "MaskLayer2d: a single (C x 128) tile exceeds the VMEM budget; "
            "channel tiling is not implemented.")
    return 1, min(HW, int(n_units) * 128)


def mask_layer_2d(x, S, *, append=True, value=0.0):
    """Pallas implementation of MaskLayer2d.forward((x, S))."""
    N, C, H, W = x.shape
    assert S.shape == (N, 1, H, W), "mask S expected as (N, 1, H, W)"
    HW = H * W
    C_out = C + 1 if append else C
    value = float(value)                   # trace-time constant, not a tracer

    x3 = x.reshape(N, C, HW)
    S3 = S.reshape(N, 1, HW)               # native dtype; cast happens in-kernel

    x_itemsize = jnp.dtype(x.dtype).itemsize
    s_itemsize = jnp.dtype(S.dtype).itemsize

    phys_vmem, multi_tc = _device_vmem_and_cores()
    budget = (phys_vmem * 3) // 8          # 48 MiB (v5e/v6e), 24 MiB (v7x)
    vmem_limit = int(min(phys_vmem * 3 // 4, budget + (16 << 20)))

    k, hw_tile = _choose_tiling(N, C, C_out, HW, x_itemsize, s_itemsize,
                                budget, multi_tc)
    grid = (pl.cdiv(N, k), pl.cdiv(HW, hw_tile))

    def kernel(x_ref, s_ref, o_ref):
        xv = x_ref[...]                               # (k, C, hw_tile)
        sv = s_ref[...].astype(xv.dtype)              # (k, 1, hw_tile) -> bcast over C
        if value == 0.0:
            masked = xv * sv
        else:
            masked = sv * (xv - value) + value        # == x*S + value*(1-S)
        if append:
            # TODO(synk): a single full-block store (concatenate along the
            # sublane axis) would avoid the two partially masked stores, but
            # sublane-unaligned concat is a lowering risk and stores have slack
            # in this HBM-bound kernel, so keep the proven two-store form.
            o_ref[:, :C, :] = masked.astype(o_ref.dtype)
            o_ref[:, C:, :] = sv.astype(o_ref.dtype)
        else:
            o_ref[...] = masked.astype(o_ref.dtype)

    flops_per_elem = 1 if value == 0.0 else 3
    bytes_accessed = (N * C * HW * x_itemsize          # read x
                      + N * HW * s_itemsize            # read S (native width)
                      + N * C_out * HW * x_itemsize)   # write out
    cost = pl.CostEstimate(flops=flops_per_elem * N * C * HW,
                           transcendentals=0,
                           bytes_accessed=bytes_accessed)

    out = pl.pallas_call(
        kernel,
        out_shape=jax.ShapeDtypeStruct((N, C_out, HW), x.dtype),
        grid=grid,
        in_specs=[
            pl.BlockSpec((k, C, hw_tile), lambda n, h: (n, 0, h)),
            pl.BlockSpec((k, 1, hw_tile), lambda n, h: (n, 0, h)),
        ],
        out_specs=pl.BlockSpec((k, C_out, hw_tile), lambda n, h: (n, 0, h)),
        compiler_params=pltpu.CompilerParams(
            dimension_semantics=("parallel", "parallel"),
            vmem_limit_bytes=vmem_limit),
        cost_estimate=cost,
    )(x3, S3)

    # TODO(synk): when append=False and x is donatable, input_output_aliases={0: 0}
    # would let the output reuse x's HBM buffer (skipped so x stays valid for
    # the caller in eager mode).
    return out.reshape(N, C_out, H, W)


def _reference(x, S, *, append=True, value=0.0):
    out = x * S + value * (1.0 - S)
    if append:
        out = jnp.concatenate([out, S.astype(out.dtype)], axis=1)
    return out


if __name__ == "__main__":
    key = jax.random.PRNGKey(0)
    kx, ks = jax.random.split(key)

    N, C, H, W = 2, 4, 16, 16
    x = jax.random.normal(kx, (N, C, H, W), dtype=jnp.float32)
    # Binary mask {0, 1}, one channel, broadcast across the C feature channels.
    S = jax.random.bernoulli(ks, p=0.5, shape=(N, 1, H, W)).astype(jnp.float32)

    out = jax.block_until_ready(mask_layer_2d(x, S, append=True, value=0.0))
    ref = _reference(x, S, append=True, value=0.0)
    assert out.shape == (N, C + 1, H, W), out.shape
    assert jnp.allclose(out, ref, atol=1e-6), "mismatch vs reference (append=True)"

    # Also exercise the append=False / non-zero value path.
    out2 = jax.block_until_ready(mask_layer_2d(x, S, append=False, value=0.5))
    ref2 = _reference(x, S, append=False, value=0.5)
    assert out2.shape == (N, C, H, W), out2.shape
    assert jnp.allclose(out2, ref2, atol=1e-5), "mismatch vs reference (append=False)"

    print("KERNEL_OK")
</pallas_src>

<mosaic_0001>
module attributes {stable_mosaic.version = 11 : i64} {
  func.func @kernel(%arg0: i32, %arg1: i32, %arg2: memref<2x4x256xf32, #tpu.memory_space<vmem>>, %arg3: memref<2x1x256xf32, #tpu.memory_space<vmem>>, %arg4: memref<2x5x256xf32, #tpu.memory_space<vmem>>) attributes {dimension_semantics = [#tpu.dimension_semantics<parallel>, #tpu.dimension_semantics<parallel>], iteration_bounds = array<i64: 1, 1>, scalar_prefetch = 0 : i64, scratch_operands = 0 : i64, tpu.core_type = #tpu.core_type<tc>, window_params = [{transform_indices = @transform_0, window_bounds = array<i64: 2, 4, 256>}, {transform_indices = @transform_1, window_bounds = array<i64: 2, 1, 256>}, {transform_indices = @transform_2, window_bounds = array<i64: 2, 5, 256>}]} {
    %c0 = arith.constant 0 : index
    %c0_0 = arith.constant 0 : index
    %c0_1 = arith.constant 0 : index
    %0 = vector.load %arg2[%c0, %c0_0, %c0_1] : memref<2x4x256xf32, #tpu.memory_space<vmem>>, vector<2x4x256xf32>
    %c0_2 = arith.constant 0 : index
    %c0_3 = arith.constant 0 : index
    %c0_4 = arith.constant 0 : index
    %1 = vector.load %arg3[%c0_2, %c0_3, %c0_4] : memref<2x1x256xf32, #tpu.memory_space<vmem>>, vector<2x1x256xf32>
    %2 = vector.broadcast %1 : vector<2x1x256xf32> to vector<2x4x256xf32>
    %3 = arith.mulf %0, %2 : vector<2x4x256xf32>
    %c0_5 = arith.constant 0 : index
    %c0_6 = arith.constant 0 : index
    %c0_7 = arith.constant 0 : index
    %4 = vector.load %arg4[%c0_5, %c0_6, %c0_7] : memref<2x5x256xf32, #tpu.memory_space<vmem>>, vector<2x4x256xf32>
    tpu.vector_store %arg4[%c0_5, %c0_6, %c0_7], %3 {strides = array<i32>} : memref<2x5x256xf32, #tpu.memory_space<vmem>>, vector<2x4x256xf32>,
    %c0_8 = arith.constant 0 : index
    %c4 = arith.constant 4 : index
    %c0_9 = arith.constant 0 : index
    %5 = vector.load %arg4[%c0_8, %c4, %c0_9] : memref<2x5x256xf32, #tpu.memory_space<vmem>>, vector<2x1x256xf32>
    tpu.vector_store %arg4[%c0_8, %c4, %c0_9], %1 {strides = array<i32>} : memref<2x5x256xf32, #tpu.memory_space<vmem>>, vector<2x1x256xf32>,
    return
  }
  func.func @transform_0(%arg0: i32, %arg1: i32) -> (i32, i32, i32) {
    %c0_i32 = arith.constant 0 : i32
    %c0_i32_0 = arith.constant 0 : i32
    return %arg0, %c0_i32, %arg1 : i32, i32, i32
  }
  func.func @transform_1(%arg0: i32, %arg1: i32) -> (i32, i32, i32) {
    %c0_i32 = arith.constant 0 : i32
    %c0_i32_0 = arith.constant 0 : i32
    return %arg0, %c0_i32, %arg1 : i32, i32, i32
  }
  func.func @transform_2(%arg0: i32, %arg1: i32) -> (i32, i32, i32) {
    %c0_i32 = arith.constant 0 : i32
    %c0_i32_0 = arith.constant 0 : i32
    return %arg0, %c0_i32, %arg1 : i32, i32, i32
  }
}

</mosaic_0001>

<bundles_post_ra>
// kernel: tpu_custom_call.1
= control target key start
LH: loop header
LB: loop body
LE: loop exit
PB: predicated region body
PF: predicated region fallthrough
CT: control target
= control target key end

     0   :  { %7 = vsyncpa [#allocation3], 0  ;;  %s190_s0 = inlined_call_operand.hbm [shape: f32[2,4,256], index: 0, kind: input, shape index: {}]   ;;  %s191_s1 = inlined_call_operand.hbm [shape: f32[2,1,256], index: 1, kind: input, shape index: {}]   ;;  %s192_s2 = inlined_call_operand.vmem [shape: f32[2,5,256], index: 2, kind: output, shape index: {}]  }
   0x1   :  { %8 = vsyncpa [#allocation5], 0  ;;  %s145_s9 = smov [#allocation2]  }
   0x2   :  { %s14_s10 = sshll.u32 %s145_s9, 4  ;;  %s15_s10 = int_to_ptr.vmem [resolvable:$true] %s14_s10 }
   0x3   :  { %s109_s11 = scalar_lea.vmem %s15_s10, 256  ;;  %p114_p1 = scmp.lt.s32.totalorder %s15_s10, %s15_s10 }
   0x4   :  { %p110_p0 = scmp.ne.s32.totalorder %s15_s10, %s109_s11  ;;  %p115_p2 = scmp.lt.s32.totalorder %s109_s11, %s109_s11 }
   0x6   :  { %p116_p3 = por %p115_p2, %p114_p1 }
   0x8   :  { %p117_p4 = pnand %p116_p3, %p110_p0 }
   0xa   :  { %120 = shalt.err (!%p117_p4)
}
   0xb   :  { %s146_s12 = smov 128   ;;  %s147_s13 = smov 8  }
   0xc   :  { %20 = dma.hbm_to_vmem [thread:$0]  %s190_s0, 256, %s15_s10, [#allocation3], %s146_s12, %s146_s12, %s147_s13  }
   0xd   :  { %s148_s16 = smov [#allocation4]  }
   0xe   :  { %s26_s17 = sshll.u32 %s148_s16, 4  ;;  %s27_s17 = int_to_ptr.vmem [resolvable:$true] %s26_s17 }
   0xf   :  { %s129_s18 = scalar_lea.vmem %s27_s17, 64  ;;  %p134_p6 = scmp.lt.s32.totalorder %s27_s17, %s27_s17 }
  0x10   :  { %p130_p5 = scmp.ne.s32.totalorder %s27_s17, %s129_s18  ;;  %p135_p7 = scmp.lt.s32.totalorder %s129_s18, %s129_s18 }
  0x12   :  { %p136_p8 = por %p135_p7, %p134_p6 }
  0x14   :  { %p137_p9 = pnand %p136_p8, %p130_p5 }
  0x16   :  { %140 = shalt.err (!%p137_p9)
}
  0x17   :  { %s149_s19 = smov 32   ;;  %s150_s20 = smov 2  }
  0x18   :  { %32 = dma.hbm_to_vmem [thread:$0]  %s191_s1, 64, %s27_s17, [#allocation5], %s149_s19, %s149_s19, %s150_s20  }
  0x19   :  { %141 = dma.done.wait [#allocation3], 256  }
  0x1a   :  { %142 = vsyncadd [#allocation3], 4294967040 }
  0x1b   :  { %143 = dma.done.wait [#allocation5], 64  }
  0x1c   :  { %144 = vsyncadd [#allocation5], 4294967232  ;;  %v45_v0 = vlaneseq  ;;  %v41_v4 = vld [vmem:[#allocation4] sm:$0x3]  ;;  %v42_v7 = vld [vmem:[#allocation4 + $0x2] sm:$0x3] }
  0x1d   :  { %v39_v8 = vld [vmem:[#allocation2] sm:$0xff]  ;;  %v40_v12 = vld [vmem:[#allocation2 + $0x8] sm:$0xff] }
  0x1e   :  { %v46_v1 = vshrl.u32 %v45_v0, 7  ;;  %vm79_vm0 = vcmp.lt.s32.totalorder %v45_v0, 256 }
  0x1f   :  { %93 = vst.msk [vmem:[%s192_s2 + $0x4] ss:$8 sm:$0x3] %vm79_vm0, %v41_v4  ;;  %94 = vst.msk [vmem:[%s192_s2 + $0x14] ss:$8 sm:$0x3] %vm79_vm0, %v42_v7 }
  0x20   :  { %v47_v2 = vsub.s32 0, %v46_v1  ;;  %v51_v3 = vsub.s32 1, %v46_v1 }
  0x22   :  { %v48_v5 = vrot.slane %v41_v4, %v47_v2  ;;  %v52_v6 = vrot.slane %v41_v4, %v51_v3  ;;  %v56_v9 = vrot.slane %v42_v7, %v47_v2  ;;  %v60_v10 = vrot.slane %v42_v7, %v51_v3 }
  0x24   :  { %v61_v11 = vcombine.low %v48_v5, %v52_v6  ;;  %v62_v13 = vcombine.low %v56_v9, %v60_v10 }
  0x26   :  { %v65_v14 = vmul.f32 %v61_v11, %v39_v8  ;;  %v66_v15 = vmul.f32 %v62_v13, %v40_v12 }
  0x28   :  { %73 = vst [vmem:[%s192_s2] sm:$0xf] %v65_v14  ;;  %v69_v16 = vcombine.high %v65_v14, %v65_v14  ;;  %75 = vst [vmem:[%s192_s2 + $0x10] sm:$0xf] %v66_v15  ;;  %v70_v17 = vcombine.high %v66_v15, %v66_v15 }
  0x2a   :  { %74 = vst [vmem:[%s192_s2 + $0x8] sm:$0xf] %v69_v16  ;;  %76 = vst [vmem:[%s192_s2 + $0x18] sm:$0xf] %v70_v17 }
  0x2b   :  { %91 = vsyncpa [#allocation3], 1 }
  0x2c   :  { %92 = vsyncpa [#allocation5], 1 }

</bundles_post_ra>
